<compile_context>
chip_gen: v7x
topology: tpu7x:2x2x1
jax: 0.10.0
libtpu: 0.0.40
codegen_flags: <defaults>
</compile_context>

<pallas_src>
import math

import jax
import jax.numpy as jnp
from jax.experimental import pallas as pl
from jax.experimental.pallas import tpu as pltpu


def _attention_head_kernel(x_ref, wqkv_ref, o_ref):
    # x_ref: (Bb, S, D) block of batch elements; wqkv_ref: (D, 3D) fused,
    # pre-transposed weight; o_ref: (Bb, S, D) float32 output block.
    Bb, S, D = x_ref.shape
    cdt = x_ref.dtype                       # MXU operand dtype (f32 or bf16)

    x = x_ref[...].reshape(Bb * S, D)       # leading-dim merge only
    wqkv = wqkv_ref[...]                    # (D, 3D), already transposed host-side

    # Fused q/k/v projection: one MXU matmul, f32 accumulation.
    qkv = jnp.dot(x, wqkv, preferred_element_type=jnp.float32)   # (Bb*S, 3D)
    qkv = qkv.reshape(Bb, S, 3 * D)
    q = qkv[:, :, 0 * D:1 * D]
    k = qkv[:, :, 1 * D:2 * D]
    v = qkv[:, :, 2 * D:3 * D]

    # Attention scores: contract the last (D) dims directly -- no k transpose.
    scale = 1.0 / math.sqrt(D)
    scores = jnp.einsum(
        "bqd,bkd->bqk", q.astype(cdt), k.astype(cdt),
        preferred_element_type=jnp.float32) * scale              # (Bb, S, S)

    # Causal (lower-triangular) mask; diagonal is always valid so -inf is safe.
    row = jax.lax.broadcasted_iota(jnp.int32, (Bb, S, S), 1)
    col = jax.lax.broadcasted_iota(jnp.int32, (Bb, S, S), 2)
    masked = jnp.where(row >= col, scores, -jnp.inf)

    # Softmax over the last dim in float32 (matches F.softmax(..., dtype=f32)).
    m = jnp.max(masked, axis=-1, keepdims=True)
    e = jnp.exp(masked - m)
    denom = jnp.sum(e, axis=-1, keepdims=True)
    attn = e * pl.reciprocal(denom, approx=True)                 # EUP slot, ~free

    out = jnp.einsum(
        "bqk,bkd->bqd", attn.astype(cdt), v.astype(cdt),
        preferred_element_type=jnp.float32)                      # (Bb, S, D)

    o_ref[...] = out.astype(o_ref.dtype)


def _pick_batch_block(B, S, *, max_rows=512, max_score_bytes=4 << 20):
    """Largest divisor Bb of B keeping the per-step working set modest.

    Bb*S rows feed the fused projection (target >= 256 when possible);
    Bb*S*S*4 bytes is the f32 score block.  Caps keep the double-buffered
    blocks comfortably inside v7x's 32 MiB default scoped VMEM as well.
    """
    best = 1
    for bb in range(1, B + 1):
        if B % bb == 0 and bb * S <= max_rows and bb * S * S * 4 <= max_score_bytes:
            best = bb
    return best


def attention_head(x, wq, wk, wv, *, matmul_dtype=None):
    """Causal single-head attention (eval-mode: dropout is identity).

    x: (B, S, D); wq/wk/wv: (D, D) nn.Linear weights (out_features, in_features).
    matmul_dtype: optionally cast MXU operands (e.g. jnp.bfloat16 on v6e/v7x);
                  accumulation, mask and softmax always stay in float32.
    """
    B, S, D = x.shape

    # Fuse + pre-transpose ONCE on host: x @ wqkv == [x@wq.T | x@wk.T | x@wv.T].
    wqkv = jnp.concatenate([wq.T, wk.T, wv.T], axis=1)           # (D, 3D)
    if matmul_dtype is not None:
        x = x.astype(matmul_dtype)
        wqkv = wqkv.astype(matmul_dtype)

    Bb = _pick_batch_block(B, S)
    grid = (B // Bb,)

    cost = pl.CostEstimate(
        flops=2 * B * (3 * S * D * D + 2 * S * S * D),
        transcendentals=B * S * S,
        bytes_accessed=(B * S * D + 3 * D * D) * x.dtype.itemsize + B * S * D * 4,
    )

    return pl.pallas_call(
        _attention_head_kernel,
        out_shape=jax.ShapeDtypeStruct((B, S, D), jnp.float32),
        grid_spec=pltpu.PrefetchScalarGridSpec(
            num_scalar_prefetch=0,
            grid=grid,
            in_specs=[
                pl.BlockSpec((Bb, S, D), lambda i: (i, 0, 0)),
                pl.BlockSpec((D, 3 * D), lambda i: (0, 0)),
            ],
            out_specs=pl.BlockSpec((Bb, S, D), lambda i: (i, 0, 0)),
        ),
        # Batch-block axis is embarrassingly parallel -> megacore sharding.
        compiler_params=pltpu.CompilerParams(
            dimension_semantics=("parallel",)),
        cost_estimate=cost,
    )(x, wqkv)


def _reference(x, wq, wk, wv):
    """Pure-JAX reference matching the PyTorch forward (eval mode)."""
    D = x.shape[-1]
    q = jnp.einsum("bsd,ed->bse", x, wq)
    k = jnp.einsum("bsd,ed->bse", x, wk)
    v = jnp.einsum("bsd,ed->bse", x, wv)
    scores = jnp.einsum("bqd,bkd->bqk", q, k) / math.sqrt(D)
    S = x.shape[1]
    mask = jnp.tril(jnp.ones((S, S), dtype=bool))
    masked = jnp.where(mask, scores, -jnp.inf)
    w = jax.nn.softmax(masked.astype(jnp.float32), axis=-1)
    return jnp.einsum("bqk,bkd->bqd", w, v.astype(jnp.float32))


if __name__ == "__main__":
    # Shapes consistent with the module: max_sequence_length=8, head_dimension=32.
    B, S, D = 2, 8, 32
    key = jax.random.PRNGKey(0)
    kx, kq, kk, kv = jax.random.split(key, 4)

    x = jax.random.normal(kx, (B, S, D), dtype=jnp.float32)
    bound = 1.0 / math.sqrt(D)       # nn.Linear-style init range, (out, in) layout
    wq = jax.random.uniform(kq, (D, D), jnp.float32, -bound, bound)
    wk = jax.random.uniform(kk, (D, D), jnp.float32, -bound, bound)
    wv = jax.random.uniform(kv, (D, D), jnp.float32, -bound, bound)

    ref = _reference(x, wq, wk, wv)

    # f32-operand path; tolerance loosened slightly for the approx reciprocal.
    out = jax.block_until_ready(attention_head(x, wq, wk, wv))
    assert out.shape == (B, S, D) and out.dtype == jnp.float32
    assert jnp.allclose(out, ref, atol=5e-3, rtol=5e-3), "mismatch vs reference (f32)"

    # bf16 MXU-operand path (recommended on v6e/v7x); f32 accumulation, looser tol.
    out_bf16 = jax.block_until_ready(
        attention_head(x, wq, wk, wv, matmul_dtype=jnp.bfloat16))
    assert out_bf16.shape == (B, S, D)
    assert jnp.allclose(out_bf16, ref, atol=5e-2, rtol=5e-2), "mismatch vs reference (bf16)"

    print("KERNEL_OK")
</pallas_src>

<mosaic_0001>
module attributes {stable_mosaic.version = 11 : i64} {
  func.func @_attention_head_kernel(%arg0: i32, %arg1: memref<2x8x32xf32, #tpu.memory_space<vmem>>, %arg2: memref<32x96xf32, #tpu.memory_space<vmem>>, %arg3: memref<2x8x32xf32, #tpu.memory_space<vmem>>) attributes {dimension_semantics = [#tpu.dimension_semantics<parallel>], iteration_bounds = array<i64: 1>, scalar_prefetch = 0 : i64, scratch_operands = 0 : i64, tpu.core_type = #tpu.core_type<tc>, window_params = [{transform_indices = @transform_0, window_bounds = array<i64: 2, 8, 32>}, {pipeline_mode = #tpu.pipeline_mode<synchronous>, transform_indices = @transform_1, window_bounds = array<i64: 32, 96>}, {transform_indices = @transform_2, window_bounds = array<i64: 2, 8, 32>}]} {
    %c0 = arith.constant 0 : index
    %c0_0 = arith.constant 0 : index
    %c0_1 = arith.constant 0 : index
    %0 = vector.load %arg1[%c0, %c0_0, %c0_1] : memref<2x8x32xf32, #tpu.memory_space<vmem>>, vector<2x8x32xf32>
    %1 = vector.shape_cast %0 : vector<2x8x32xf32> to vector<16x32xf32>
    %c0_2 = arith.constant 0 : index
    %c0_3 = arith.constant 0 : index
    %2 = vector.load %arg2[%c0_2, %c0_3] : memref<32x96xf32, #tpu.memory_space<vmem>>, vector<32x96xf32>
    %cst = arith.constant dense<0.000000e+00> : vector<16x96xf32>
    %3 = tpu.matmul %1, %2, %cst {dimension_numbers = #tpu.dot_dimension_numbers<[1], [0], [0], [1], [0, 0, 1, 1], [], []>} : vector<16x32xf32>, vector<32x96xf32>, vector<16x96xf32> -> vector<16x96xf32>
    %4 = vector.shape_cast %3 : vector<16x96xf32> to vector<2x8x96xf32>
    %5 = vector.extract_strided_slice %4 {offsets = [0, 0, 0], sizes = [2, 8, 32], strides = [1, 1, 1]} : vector<2x8x96xf32> to vector<2x8x32xf32>
    %6 = vector.extract_strided_slice %4 {offsets = [0, 0, 32], sizes = [2, 8, 32], strides = [1, 1, 1]} : vector<2x8x96xf32> to vector<2x8x32xf32>
    %7 = vector.extract_strided_slice %4 {offsets = [0, 0, 64], sizes = [2, 8, 32], strides = [1, 1, 1]} : vector<2x8x96xf32> to vector<2x8x32xf32>
    "tpu.trace_start"() <{level = 10 : i32, message = "bqd,bkd->bqk"}> : () -> ()
    %cst_4 = arith.constant dense<0.000000e+00> : vector<2x8x8xf32>
    %8 = tpu.matmul %5, %6, %cst_4 {dimension_numbers = #tpu.dot_dimension_numbers<[2], [2], [1], [1], [0, 0, 0, 1, 1, 1], [0], [0]>} : vector<2x8x32xf32>, vector<2x8x32xf32>, vector<2x8x8xf32> -> vector<2x8x8xf32>
    "tpu.trace_stop"() : () -> ()
    %cst_5 = arith.constant 0.176776692 : f32
    %9 = vector.broadcast %cst_5 : f32 to vector<2x8x8xf32>
    %10 = arith.mulf %8, %9 : vector<2x8x8xf32>
    %11 = tpu.iota {dimensions = array<i32: 1>} : vector<2x8x8xi32>
    %12 = tpu.iota {dimensions = array<i32: 2>} : vector<2x8x8xi32>
    %13 = arith.cmpi sge, %11, %12 : vector<2x8x8xi32>
    %cst_6 = arith.constant 0xFF800000 : f32
    %14 = vector.broadcast %cst_6 : f32 to vector<2x8x8xf32>
    %15 = arith.select %13, %10, %14 : vector<2x8x8xi1>, vector<2x8x8xf32>
    %cst_7 = arith.constant dense<0xFF800000> : vector<2x8xf32>
    %16 = vector.multi_reduction <maximumf>, %15, %cst_7 [2] : vector<2x8x8xf32> to vector<2x8xf32>
    %17 = vector.shape_cast %16 : vector<2x8xf32> to vector<2x8x1xf32>
    %18 = vector.broadcast %17 : vector<2x8x1xf32> to vector<2x8x8xf32>
    %19 = arith.subf %15, %18 : vector<2x8x8xf32>
    %20 = math.exp %19 : vector<2x8x8xf32>
    %cst_8 = arith.constant dense<0.000000e+00> : vector<2x8xf32>
    %21 = vector.multi_reduction <add>, %20, %cst_8 [2] : vector<2x8x8xf32> to vector<2x8xf32>
    %22 = vector.shape_cast %21 : vector<2x8xf32> to vector<2x8x1xf32>
    %23 = tpu.reciprocal %22 {approx = true} : vector<2x8x1xf32> -> vector<2x8x1xf32>
    %24 = vector.broadcast %23 : vector<2x8x1xf32> to vector<2x8x8xf32>
    %25 = arith.mulf %20, %24 : vector<2x8x8xf32>
    "tpu.trace_start"() <{level = 10 : i32, message = "bqk,bkd->bqd"}> : () -> ()
    %cst_9 = arith.constant dense<0.000000e+00> : vector<2x8x32xf32>
    %26 = tpu.matmul %25, %7, %cst_9 {dimension_numbers = #tpu.dot_dimension_numbers<[2], [1], [1], [2], [0, 0, 0, 1, 1, 2], [0], [0]>} : vector<2x8x8xf32>, vector<2x8x32xf32>, vector<2x8x32xf32> -> vector<2x8x32xf32>
    "tpu.trace_stop"() : () -> ()
    %c0_10 = arith.constant 0 : index
    %c0_11 = arith.constant 0 : index
    %c0_12 = arith.constant 0 : index
    %27 = vector.load %arg3[%c0_10, %c0_11, %c0_12] : memref<2x8x32xf32, #tpu.memory_space<vmem>>, vector<2x8x32xf32>
    tpu.vector_store %arg3[%c0_10, %c0_11, %c0_12], %26 {strides = array<i32>} : memref<2x8x32xf32, #tpu.memory_space<vmem>>, vector<2x8x32xf32>,
    return
  }
  func.func @transform_0(%arg0: i32) -> (i32, i32, i32) {
    %c0_i32 = arith.constant 0 : i32
    %c0_i32_0 = arith.constant 0 : i32
    %c0_i32_1 = arith.constant 0 : i32
    return %arg0, %c0_i32, %c0_i32_0 : i32, i32, i32
  }
  func.func @transform_1(%arg0: i32) -> (i32, i32) {
    %c0_i32 = arith.constant 0 : i32
    %c0_i32_0 = arith.constant 0 : i32
    %c0_i32_1 = arith.constant 0 : i32
    return %c0_i32, %c0_i32_0 : i32, i32
  }
  func.func @transform_2(%arg0: i32) -> (i32, i32, i32) {
    %c0_i32 = arith.constant 0 : i32
    %c0_i32_0 = arith.constant 0 : i32
    %c0_i32_1 = arith.constant 0 : i32
    return %arg0, %c0_i32, %c0_i32_0 : i32, i32, i32
  }
}

</mosaic_0001>

<bundles_post_ra>
// kernel: tpu_custom_call.1
= control target key start
LH: loop header
LB: loop body
LE: loop exit
PB: predicated region body
PF: predicated region fallthrough
CT: control target
= control target key end

     0   :  { %7 = vsyncpa [#allocation3], 0  ;;  %s723_s0 = inlined_call_operand.hbm [shape: f32[2,8,32], index: 0, kind: input, shape index: {}]   ;;  %s724_s1 = inlined_call_operand.hbm [shape: f32[32,96], index: 1, kind: input, shape index: {}]   ;;  %s725_s2 = inlined_call_operand.hbm [shape: f32[2,8,32], index: 2, kind: output, shape index: {}]  }
   0x1   :  { %8 = vsyncpa [#allocation6], 0 }
   0x2   :  { %9 = vsyncpa [#allocation4], 0  ;;  %s636_s9 = smov [#allocation2]   ;;  %s564_s13 = scalar_lea.hbm %s723_s0, 256 }
   0x3   :  { %s15_s10 = sshll.u32 %s636_s9, 4  ;;  %p565_p0 = scmp.ne.s32.totalorder %s723_s0, %s564_s13  ;;  %s16_s10 = int_to_ptr.vmem [resolvable:$true] %s15_s10 }
   0x4   :  { %p568_p1 = scmp.lt.u32.totalorder %s564_s13, %s723_s0 }
   0x6   :  { %p570_p2 = pnand %p568_p1, %p565_p0 }
   0x8   :  { %573 = shalt.err (!%p570_p2)
}
   0x9   :  { %s574_s18 = scalar_lea.vmem %s16_s10, 256  ;;  %p579_p4 = scmp.lt.s32.totalorder %s16_s10, %s16_s10 }
   0xa   :  { %p575_p3 = scmp.ne.s32.totalorder %s16_s10, %s574_s18  ;;  %p580_p5 = scmp.lt.s32.totalorder %s574_s18, %s574_s18 }
   0xc   :  { %p581_p6 = por %p580_p5, %p579_p4 }
   0xe   :  { %p582_p7 = pnand %p581_p6, %p575_p3 }
  0x10   :  { %585 = shalt.err (!%p582_p7)
}
  0x11   :  { %s637_s19 = smov 128   ;;  %s638_s20 = smov 8  }
  0x12   :  { %21 = dma.hbm_to_vmem [thread:$0]  %s723_s0, 256, %s16_s10, [#allocation3], %s637_s19, %s637_s19, %s638_s20  }
  0x13   :  { %s639_s23 = smov [#allocation5]   ;;  %s586_s27 = scalar_lea.hbm %s724_s1, 512 }
  0x14   :  { %s27_s24 = sshll.u32 %s639_s23, 4  ;;  %p587_p8 = scmp.ne.s32.totalorder %s724_s1, %s586_s27  ;;  %s28_s24 = int_to_ptr.vmem [resolvable:$true] %s27_s24 }
  0x15   :  { %p590_p9 = scmp.lt.u32.totalorder %s586_s27, %s724_s1 }
  0x17   :  { %p592_p10 = pnand %p590_p9, %p587_p8 }
  0x19   :  { %595 = shalt.err (!%p592_p10)
}
  0x1a   :  { %s596_s4 = scalar_lea.vmem %s28_s24, 512  ;;  %p601_p12 = scmp.lt.s32.totalorder %s28_s24, %s28_s24 }
  0x1b   :  { %p597_p11 = scmp.ne.s32.totalorder %s28_s24, %s596_s4  ;;  %p602_p13 = scmp.lt.s32.totalorder %s596_s4, %s596_s4 }
  0x1d   :  { %p603_p0 = por %p602_p13, %p601_p12 }
  0x1f   :  { %p604_p1 = pnand %p603_p0, %p597_p11 }
  0x21   :  { %607 = shalt.err (!%p604_p1)
}
  0x22   :  { %33 = dma.hbm_to_vmem [thread:$0]  %s724_s1, 512, %s28_s24, [#allocation6], %s637_s19, %s637_s19, %s638_s20  }
  0x23   :  { %630 = dma.done.wait [#allocation3], 256  }
  0x24   :  { %631 = vsyncadd [#allocation3], 4294967040 }
  0x25   :  { %632 = dma.done.wait [#allocation6], 512  }
  0x26   :  { %633 = vsyncadd [#allocation6], 4294966784  ;;  %vm46_vm0 = vcmask 261120   ;;  %v42_v0 = vld [vmem:[#allocation5] sm:$0xff]  ;;  %v43_v1 = vld [vmem:[#allocation5 + $0x8] sm:$0xff]  ;;  %v640_v8 = vmov 0.0   ;;  %v284_v13 = vlaneseq }
  0x27   :  { %v44_v2 = vld [vmem:[#allocation5 + $0x10] sm:$0xff]  ;;  %v539_v3 = vpack.c.bf16 %v43_v1, %v42_v0  ;;  %v45_v4 = vld [vmem:[#allocation5 + $0x18] sm:$0xff]  ;;  %519 = vmatprep.subr.mxu1 %v640_v8  ;;  %vm641_vm1 = vmmov 0   ;;  %s642_s1 = smov 96   ;;  %vm291_vm3 = vcmask 64512   ;;  %s643_s6 = smov 64  }
  0x28   :  { %v40_v5 = vld [vmem:[#allocation2] sm:$0xff]  ;;  %v543_v6 = vpack.c.bf16 %v45_v4, %v44_v2  ;;  %v41_v7 = vld [vmem:[#allocation2 + $0x8] sm:$0xff]  ;;  %521 = vmatprep.mubr.msk.f32.mxu1 %vm641_vm1, %v640_v8  ;;  %v285_v14 = vshrl.u32 %v284_v13, 7  ;;  %v287_v15 = vand.u32 127, %v284_v13  ;;  %s644_s7 = smov [#allocation7]  }
  0x29   :  { %516 = vmatprep.mubr.msk.f32.mxu0 %vm46_vm0, %v40_v5  ;;  %540 = vmatprep.subr.bf16.mxu0 %v539_v3  ;;  %s473_s8 = sshll.u32 %s644_s7, 4  ;;  %s474_s8 = int_to_ptr.vmem [resolvable:$true] %s473_s8 }
  0x2a   :  { %542 = vmatpush3.bf16.msra.mxu0 %v539_v3  ;;  %vm288_vm2 = vcmp.ge.s32.totalorder %v285_v14, %v287_v15  ;;  %s608_s9 = scalar_lea.vmem %s474_s8, 256  ;;  %p613_p3 = scmp.lt.s32.totalorder %s474_s8, %s474_s8 }
  0x2b   :  { %544 = vmatprep.subr.bf16.mxu0 %v543_v6  ;;  %p609_p2 = scmp.ne.s32.totalorder %s474_s8, %s608_s9  ;;  %p614_p4 = scmp.lt.s32.totalorder %s608_s9, %s608_s9 }
  0x2d   :  { %p615_p5 = por %p614_p4, %p613_p3 }
  0x2e   :  { %546 = vmatpush3.bf16.msra.mxu0 %v543_v6 }
  0x2f   :  { %529 = vmatprep.subr.mxu0 %v640_v8  ;;  %p616_p6 = pnand %p615_p5, %p609_p2 }
  0x31   :  { %517 = vmatmul.mubr.msk.f32.vlgmr.msra.gmra.mrb[0].mxu0 %vm46_vm0, %v41_v7 }
  0x32   :  { %531 = vmatprep.mubr.msk.f32.mxu0 %vm641_vm1, %v640_v8 }
 0x104   :  { %v518_v9 = vpop.f32.mrb[0].mxu0 }
 0x105   :  { %v119_v10 = vpop.f32.mrb[1].mxu0 }
 0x106   :  { %129 = vrot.lane.b32.xlu0 %v119_v10, %s642_s1 }
 0x10a   :  { %206 = vrot.lane.b32.xlu0 %v518_v9, %s642_s1 }
 0x178   :  { %v130_v11 = vpop.permute.xlu0 %129 }
 0x179   :  { %520 = vmatpush3.xpose.msk.msra.mxu1 %vm46_vm0, %v130_v11 }
 0x17a   :  { %524 = vmatprep.subr.mxu1 %v640_v8 }
 0x17c   :  { %522 = vmatmul.mubr.msk.f32.vlgmr.msra.gmra.mrb[0].mxu1 %vm46_vm0, %v119_v10  ;;  %v207_v12 = vpop.permute.xlu0 %206 }
 0x17d   :  { %525 = vmatpush3.xpose.msk.msra.mxu1 %vm46_vm0, %v207_v12  ;;  %526 = vmatprep.mubr.msk.f32.mxu1 %vm641_vm1, %v640_v8 }
 0x17e   :  { %534 = vmatprep.subr.mxu1 %v640_v8 }
 0x180   :  { %527 = vmatmul.mubr.msk.f32.vlgmr.msra.gmra.mrb[2].mxu1 %vm46_vm0, %v518_v9 }
 0x181   :  { %536 = vmatprep.mubr.msk.f32.mxu1 %vm641_vm1, %v640_v8 }
 0x24f   :  { %v201_v16 = vpop.f32.mrb[0].mxu1 }
 0x250   :  { %v282_v17 = vmul.f32 0.17677669, %v201_v16  ;;  %v523_v18 = vpop.f32.mrb[1].mxu1 }
 0x252   :  { %v289_v19 = vsel %vm288_vm2, %v282_v17, -inf }
 0x253   :  { %v278_v20 = vpop.f32.mrb[2].mxu1  ;;  %v292_v21 = vsel %vm291_vm3, %v289_v19, -inf }
 0x254   :  { %v283_v22 = vmul.f32 0.17677669, %v278_v20  ;;  %293 = vmax.xlane.f32.xlu1 %v292_v21  ;;  %v528_v23 = vpop.f32.mrb[3].mxu1 }
 0x256   :  { %v290_v24 = vsel %vm288_vm2, %v283_v22, -inf }
 0x257   :  { %v295_v25 = vsel %vm291_vm3, %v290_v24, -inf }
 0x258   :  { %296 = vmax.xlane.f32.xlu1 %v295_v25 }
 0x269   :  { %314 = vrot.lane.b32.xlu1 %v119_v10, %s643_s6 }
 0x2e1   :  { %v294_v26 = vpop.xlane.xlu1 %293 }
 0x2e2   :  { %v298_v27 = vsub.f32 %v289_v19, %v294_v26 }
 0x2e4   :  { %v300_v28 = vmul.f32 1.442695, %v298_v27 }
 0x2e5   :  { %v297_v29 = vpop.xlane.xlu1 %296 }
 0x2e6   :  { %556 = vpow2.f32 %v300_v28  ;;  %v299_v30 = vsub.f32 %v290_v24, %v297_v29 }
 0x2e8   :  { %v302_v31 = vmul.f32 1.442695, %v299_v30 }
 0x2e9   :  { %v315_v32 = vpop.permute.xlu1 %314 }
 0x2ea   :  { %558 = vpow2.f32 %v302_v31  ;;  %530 = vmatpush3.msra.mxu0 %v315_v32 }
 0x2f0   :  { %v557_v33 = vpop.eup %556 }
 0x2f1   :  { %v304_v34 = vsel %vm291_vm3, %v557_v33, 0.0 }
 0x2f2   :  { %305 = vadd.xlane.f32.xlu0 %v304_v34 }
 0x2f4   :  { %v559_v35 = vpop.eup %558 }
 0x2f5   :  { %v307_v36 = vsel %vm291_vm3, %v559_v35, 0.0 }
 0x2f6   :  { %308 = vadd.xlane.f32.xlu1 %v307_v36 }
 0x307   :  { %390 = vrot.lane.b32.xlu1 %v518_v9, %s643_s6 }
 0x37f   :  { %v306_v37 = vpop.xlane.xlu0 %305 }
 0x380   :  { %560 = vrcp.f32 %v306_v37 }
 0x383   :  { %v309_v38 = vpop.xlane.xlu1 %308 }
 0x384   :  { %562 = vrcp.f32 %v309_v38 }
 0x387   :  { %v391_v39 = vpop.permute.xlu1 %390 }
 0x388   :  { %535 = vmatpush3.msra.mxu1 %v391_v39 }
 0x38a   :  { %v561_v40 = vpop.eup %560 }
 0x38b   :  { %v312_v41 = vmul.f32 %v561_v40, %v557_v33 }
 0x38d   :  { %532 = vmatmul.mubr.msk.f32.vlgmr.msra.gmra.mrb[2].mxu0 %vm291_vm3, %v312_v41 }
 0x38e   :  { %v563_v42 = vpop.eup %562 }
 0x38f   :  { %v313_v43 = vmul.f32 %v563_v42, %v559_v35 }
 0x391   :  { %537 = vmatmul.mubr.msk.f32.vlgmr.msra.gmra.mrb[4].mxu1 %vm291_vm3, %v313_v43 }
 0x460   :  { %v386_v44 = vpop.f32.mrb[2].mxu0 }
 0x461   :  { %466 = vst.msk [vmem:[#allocation7] sm:$0xff] %vm46_vm0, %v386_v44  ;;  %v533_v45 = vpop.f32.mrb[3].mxu0 }
 0x464   :  { %v462_v46 = vpop.f32.mrb[4].mxu1 }
 0x465   :  { %467 = vst.msk [vmem:[#allocation7 + $0x8] sm:$0xff] %vm46_vm0, %v462_v46  ;;  %v538_v47 = vpop.f32.mrb[5].mxu1 }
 0x466   :  { %619 = shalt.err (!%p616_p6)
}
 0x467   :  { %s620_s12 = scalar_lea.hbm %s725_s2, 256 }
 0x468   :  { %p621_p7 = scmp.ne.s32.totalorder %s725_s2, %s620_s12  ;;  %p624_p8 = scmp.lt.u32.totalorder %s620_s12, %s725_s2 }
 0x46a   :  { %p626_p9 = pnand %p624_p8, %p621_p7 }
 0x46c   :  { %629 = shalt.err (!%p626_p9)
}
 0x46d   :  { %479 = dma.vmem_to_hbm [thread:$0]  %s474_s8, 256, %s725_s2, [#allocation4], %s637_s19, %s637_s19, %s638_s20  }
 0x46e   :  { %634 = dma.done.wait [#allocation4], 256  }
 0x46f   :  { %635 = vsyncadd [#allocation4], 4294967040 }
 0x470   :  { %483 = vsyncpa [#allocation3], 1 }
 0x471   :  { %484 = vsyncpa [#allocation6], 1 }
 0x472   :  { %485 = vsyncpa [#allocation4], 1 }

</bundles_post_ra>
